<compile_context>
chip_gen: v7x
topology: tpu7x:2x2x1
jax: 0.10.0
libtpu: 0.0.40
codegen_flags: <defaults>
</compile_context>

<pallas_src>
import functools

import jax
import jax.numpy as jnp
from jax.experimental import pallas as pl
from jax.experimental.pallas import tpu as pltpu


# ----------------------------------------------------------------------------
# SimSelfLoss kernel: grid over batch, (N,N) sum / sum-of-squares accumulators.
# ----------------------------------------------------------------------------
def _sim_self_loss_kernel(x_ref, o_ref, sum_ref, sq_ref, *, batch: int):
    b = pl.program_id(0)

    x = x_ref[0].astype(jnp.float32)                               # (N, D)
    inv_norm = jax.lax.rsqrt(jnp.sum(x * x, axis=-1, keepdims=True))
    xn = x * inv_norm

    dn = (((1,), (1,)), ((), ()))                                  # contract D
    sim = jax.lax.dot_general(xn, xn, dimension_numbers=dn,
                              preferred_element_type=jnp.float32)  # (N, N)
    n = sim.shape[0]
    ri = jax.lax.broadcasted_iota(jnp.int32, (n, n), 0)
    ci = jax.lax.broadcasted_iota(jnp.int32, (n, n), 1)
    sim = jnp.where(ri == ci, 0.0, sim)                            # zero diag

    @pl.when(b == 0)
    def _init():
        sum_ref[...] = jnp.zeros_like(sum_ref)
        sq_ref[...] = jnp.zeros_like(sq_ref)

    sum_ref[...] += sim
    sq_ref[...] += sim * sim

    @pl.when(b == batch - 1)
    def _finalize():
        mean = sum_ref[...] / batch
        # unbiased variance (torch.std default): sum((x-mean)^2) / (B-1)
        var = (sq_ref[...] - batch * mean * mean) / (batch - 1)
        std = jnp.sqrt(jnp.maximum(var, 0.0))
        total = jnp.sum(jnp.sum(std, axis=0, keepdims=True),
                        axis=1, keepdims=True)                     # (1, 1)
        o_ref[...] = total / (n * n) * (25.0 / 16.0) * 100.0


def sim_self_loss(sensor: jax.Array) -> jax.Array:
    b, n, d = sensor.shape
    kernel = functools.partial(_sim_self_loss_kernel, batch=b)
    out = pl.pallas_call(
        kernel,
        out_shape=jax.ShapeDtypeStruct((1, 1), jnp.float32),
        grid_spec=pltpu.PrefetchScalarGridSpec(
            num_scalar_prefetch=0,
            grid=(b,),
            in_specs=[pl.BlockSpec((1, n, d), lambda i: (i, 0, 0))],
            out_specs=pl.BlockSpec((1, 1), lambda i: (0, 0)),
            scratch_shapes=[pltpu.VMEM((n, n), jnp.float32),
                            pltpu.VMEM((n, n), jnp.float32)],
        ),
        compiler_params=pltpu.CompilerParams(
            dimension_semantics=("arbitrary",)),
        cost_estimate=pl.CostEstimate(
            flops=2 * b * n * n * d,
            transcendentals=b * n + n * n,
            bytes_accessed=b * n * d * sensor.dtype.itemsize + 4),
    )(sensor)
    return out[0, 0]


# ----------------------------------------------------------------------------
# ContrastiveLoss kernel: 2-D grid (row blocks x column tiles), online LSE for
# both CE(C @ V^T) and CE(V @ C^T) in one pass; per-row losses as output.
# ----------------------------------------------------------------------------
def _contrastive_ce_kernel(c_row_ref, v_row_ref, v_col_ref, c_col_ref, o_ref,
                           m_c, l_c, p_c, m_v, l_v, p_v, *, num_cmg: int):
    i = pl.program_id(0)
    j = pl.program_id(1)
    nj = pl.num_programs(1)
    tm = c_row_ref.shape[0]

    @pl.when(j == 0)
    def _init():
        neg_inf = jnp.full(m_c.shape, -jnp.inf, jnp.float32)
        m_c[...] = neg_inf
        m_v[...] = neg_inf
        l_c[...] = jnp.zeros_like(l_c)
        l_v[...] = jnp.zeros_like(l_v)
        p_c[...] = jnp.zeros_like(p_c)
        p_v[...] = jnp.zeros_like(p_v)

    # Contract the feature axis directly: no explicit transpose in the kernel.
    dn = (((1,), (1,)), ((), ()))
    s_c = jax.lax.dot_general(c_row_ref[...], v_col_ref[...],
                              dimension_numbers=dn,
                              preferred_element_type=jnp.float32)  # (TM, TN)
    s_v = jax.lax.dot_general(v_row_ref[...], c_col_ref[...],
                              dimension_numbers=dn,
                              preferred_element_type=jnp.float32)  # (TM, TN)
    tn = s_c.shape[1]

    # Picked (target) logit: labels[r] = r % num_cmg. Accumulate from whichever
    # column tile contains the label; exactly one tile contributes per row.
    rows = i * tm + jax.lax.broadcasted_iota(jnp.int32, (tm, tn), 0)
    cols = j * tn + jax.lax.broadcasted_iota(jnp.int32, (tm, tn), 1)
    tgt = cols == (rows % num_cmg)
    p_c[...] += jnp.sum(jnp.where(tgt, s_c, 0.0), axis=-1, keepdims=True)
    p_v[...] += jnp.sum(jnp.where(tgt, s_v, 0.0), axis=-1, keepdims=True)

    def _lse_update(m_ref, l_ref, s):
        m_new = jnp.maximum(m_ref[...], jnp.max(s, axis=-1, keepdims=True))
        l_ref[...] = (l_ref[...] * jnp.exp(m_ref[...] - m_new)
                      + jnp.sum(jnp.exp(s - m_new), axis=-1, keepdims=True))
        m_ref[...] = m_new

    _lse_update(m_c, l_c, s_c)
    _lse_update(m_v, l_v, s_v)

    @pl.when(j == nj - 1)
    def _finalize():
        lse_c = m_c[...] + jnp.log(l_c[...])
        lse_v = m_v[...] + jnp.log(l_v[...])
        o_ref[...] = (lse_c - p_c[...]) + (lse_v - p_v[...])


def _pick_tile(m: int, target: int) -> int:
    """Largest clean tile <= target that divides m and satisfies (8,128) rules."""
    if m <= target:
        return m
    for t in (512, 384, 256, 128, 64, 32, 16, 8):
        if t <= target and m % t == 0:
            return t
    return m  # fallback: no tiling (rare ragged M)


def contrastive_loss(current: jax.Array, voltage: jax.Array) -> jax.Array:
    b, n, d = current.shape
    m = b * n
    c = current.reshape(m, d)   # batch-major flatten == torch.cat of rows
    v = voltage.reshape(m, d)

    tm = _pick_tile(m, 256)     # 256-granular rows for v6e/v7x MXU
    tn = _pick_tile(m, 512)     # column tile for the online LSE

    kernel = functools.partial(_contrastive_ce_kernel, num_cmg=n)
    per_row = pl.pallas_call(
        kernel,
        out_shape=jax.ShapeDtypeStruct((m, 1), jnp.float32),
        grid_spec=pltpu.PrefetchScalarGridSpec(
            num_scalar_prefetch=0,
            grid=(m // tm, m // tn),
            in_specs=[
                pl.BlockSpec((tm, d), lambda i, j: (i, 0)),  # current rows
                pl.BlockSpec((tm, d), lambda i, j: (i, 0)),  # voltage rows
                pl.BlockSpec((tn, d), lambda i, j: (j, 0)),  # voltage cols
                pl.BlockSpec((tn, d), lambda i, j: (j, 0)),  # current cols
            ],
            out_specs=pl.BlockSpec((tm, 1), lambda i, j: (i, 0)),
            scratch_shapes=[pltpu.VMEM((tm, 1), jnp.float32)] * 6,
        ),
        compiler_params=pltpu.CompilerParams(
            dimension_semantics=("parallel", "arbitrary")),
        cost_estimate=pl.CostEstimate(
            flops=4 * m * m * d,
            transcendentals=2 * m * m,
            bytes_accessed=4 * m * d * current.dtype.itemsize + m * 4),
    )(c, v, v, c)

    # loss = (CE_c + CE_v) / 2, both means over the same M rows.
    return jnp.sum(per_row) / (2.0 * m)


# ----------------------------------------------------------------------------
# MyLossAblation2c forward.
# ----------------------------------------------------------------------------
@jax.jit
def my_loss_ablation_2c(current1, voltage1, current2, voltage2):
    loss11 = sim_self_loss(current1)
    loss12 = sim_self_loss(voltage1)
    loss21 = contrastive_loss(current1, voltage1)
    loss22 = contrastive_loss(current2, voltage2)
    return loss11, loss12, loss21, loss22


# ----------------------------------------------------------------------------
# Pure-JAX references mirroring the PyTorch module.
# ----------------------------------------------------------------------------
def _sim_self_loss_ref(sensor):
    x = sensor.astype(jnp.float32)
    xn = x / jnp.linalg.norm(x, axis=2, keepdims=True)
    sim = jnp.einsum("bnd,bmd->bnm", xn, xn)
    n = sim.shape[1]
    sim = jnp.where(jnp.eye(n, dtype=bool)[None], 0.0, sim)
    std = jnp.std(sim, axis=0, ddof=1)
    return jnp.mean(std) * 25.0 / 16.0 * 100.0


def _contrastive_loss_ref(current, voltage):
    b, n, d = current.shape
    c = current.reshape(b * n, d).astype(jnp.float32)
    v = voltage.reshape(b * n, d).astype(jnp.float32)
    logits_c = c @ v.T
    logits_v = logits_c.T
    labels = jnp.tile(jnp.arange(n, dtype=jnp.int32), b)
    rows = jnp.arange(b * n)

    def ce(logits):
        logp = jax.nn.log_softmax(logits, axis=-1)
        return -jnp.mean(logp[rows, labels])

    return (ce(logits_c) + ce(logits_v)) / 2.0


def _reference(c1, v1, c2, v2):
    return (_sim_self_loss_ref(c1), _sim_self_loss_ref(v1),
            _contrastive_loss_ref(c1, v1), _contrastive_loss_ref(c2, v2))


if __name__ == "__main__":
    key = jax.random.PRNGKey(0)
    B, N, D = 2, 4, 32  # batch=2, num_cmg=4, feature=32
    k1, k2, k3, k4 = jax.random.split(key, 4)
    current1 = jax.random.normal(k1, (B, N, D), dtype=jnp.float32)
    voltage1 = jax.random.normal(k2, (B, N, D), dtype=jnp.float32)
    current2 = jax.random.normal(k3, (B, N, D), dtype=jnp.float32)
    voltage2 = jax.random.normal(k4, (B, N, D), dtype=jnp.float32)

    losses = jax.block_until_ready(
        my_loss_ablation_2c(current1, voltage1, current2, voltage2))
    refs = jax.block_until_ready(_reference(current1, voltage1, current2, voltage2))

    for got, want in zip(losses, refs):
        assert jnp.allclose(got, want, atol=1e-3, rtol=1e-4), (got, want)
    print("KERNEL_OK")
</pallas_src>

<mosaic_0001>
module attributes {stable_mosaic.version = 11 : i64} {
  func.func @_sim_self_loss_kernel(%arg0: i32, %arg1: memref<1x4x32xf32, #tpu.memory_space<vmem>>, %arg2: memref<1x1xf32, #tpu.memory_space<vmem>>, %arg3: memref<4x4xf32, #tpu.memory_space<vmem>>, %arg4: memref<4x4xf32, #tpu.memory_space<vmem>>) attributes {dimension_semantics = [#tpu.dimension_semantics<arbitrary>], iteration_bounds = array<i64: 2>, scalar_prefetch = 0 : i64, scratch_operands = 2 : i64, tpu.core_type = #tpu.core_type<tc>, window_params = [{transform_indices = @transform_0, window_bounds = array<i64: 1, 4, 32>}, {pipeline_mode = #tpu.pipeline_mode<synchronous>, transform_indices = @transform_1, window_bounds = array<i64: 1, 1>}]} {
    %c0 = arith.constant 0 : index
    %c0_0 = arith.constant 0 : index
    %c0_1 = arith.constant 0 : index
    %0 = vector.load %arg1[%c0, %c0_0, %c0_1] : memref<1x4x32xf32, #tpu.memory_space<vmem>>, vector<1x4x32xf32>
    %1 = vector.shape_cast %0 : vector<1x4x32xf32> to vector<4x32xf32>
    %2 = arith.mulf %1, %1 : vector<4x32xf32>
    %cst = arith.constant dense<0.000000e+00> : vector<4xf32>
    %3 = vector.multi_reduction <add>, %2, %cst [1] : vector<4x32xf32> to vector<4xf32>
    %4 = vector.shape_cast %3 : vector<4xf32> to vector<4x1xf32>
    %5 = math.rsqrt %4 : vector<4x1xf32>
    %6 = vector.broadcast %5 : vector<4x1xf32> to vector<4x32xf32>
    %7 = arith.mulf %1, %6 : vector<4x32xf32>
    %cst_2 = arith.constant dense<0.000000e+00> : vector<4x4xf32>
    %8 = tpu.matmul %7, %7, %cst_2 {dimension_numbers = #tpu.dot_dimension_numbers<[1], [1], [0], [0], [0, 0, 1, 0], [], []>} : vector<4x32xf32>, vector<4x32xf32>, vector<4x4xf32> -> vector<4x4xf32>
    %9 = tpu.iota {dimensions = array<i32: 0>} : vector<4x4xi32>
    %10 = tpu.iota {dimensions = array<i32: 1>} : vector<4x4xi32>
    %11 = arith.cmpi eq, %9, %10 : vector<4x4xi32>
    %cst_3 = arith.constant 0.000000e+00 : f32
    %12 = vector.broadcast %cst_3 : f32 to vector<4x4xf32>
    %13 = arith.select %11, %12, %8 : vector<4x4xi1>, vector<4x4xf32>
    %c0_i32 = arith.constant 0 : i32
    %14 = arith.cmpi eq, %arg0, %c0_i32 : i32
    %15 = arith.extui %14 : i1 to i32
    %c0_i32_4 = arith.constant 0 : i32
    %16 = arith.cmpi ne, %15, %c0_i32_4 : i32
    scf.if %16 {
      %cst_14 = arith.constant 0.000000e+00 : f32
      %27 = vector.broadcast %cst_14 : f32 to vector<4x4xf32>
      %c0_15 = arith.constant 0 : index
      %c0_16 = arith.constant 0 : index
      %28 = vector.load %arg3[%c0_15, %c0_16] : memref<4x4xf32, #tpu.memory_space<vmem>>, vector<4x4xf32>
      tpu.vector_store %arg3[%c0_15, %c0_16], %27 {strides = array<i32>} : memref<4x4xf32, #tpu.memory_space<vmem>>, vector<4x4xf32>,
      %cst_17 = arith.constant 0.000000e+00 : f32
      %29 = vector.broadcast %cst_17 : f32 to vector<4x4xf32>
      %c0_18 = arith.constant 0 : index
      %c0_19 = arith.constant 0 : index
      %30 = vector.load %arg4[%c0_18, %c0_19] : memref<4x4xf32, #tpu.memory_space<vmem>>, vector<4x4xf32>
      tpu.vector_store %arg4[%c0_18, %c0_19], %29 {strides = array<i32>} : memref<4x4xf32, #tpu.memory_space<vmem>>, vector<4x4xf32>,
    } else {
    }
    %c0_5 = arith.constant 0 : index
    %c0_6 = arith.constant 0 : index
    %17 = vector.load %arg3[%c0_5, %c0_6] : memref<4x4xf32, #tpu.memory_space<vmem>>, vector<4x4xf32>
    %18 = arith.addf %17, %13 : vector<4x4xf32>
    %c0_7 = arith.constant 0 : index
    %c0_8 = arith.constant 0 : index
    %19 = vector.load %arg3[%c0_7, %c0_8] : memref<4x4xf32, #tpu.memory_space<vmem>>, vector<4x4xf32>
    tpu.vector_store %arg3[%c0_7, %c0_8], %18 {strides = array<i32>} : memref<4x4xf32, #tpu.memory_space<vmem>>, vector<4x4xf32>,
    %c0_9 = arith.constant 0 : index
    %c0_10 = arith.constant 0 : index
    %20 = vector.load %arg4[%c0_9, %c0_10] : memref<4x4xf32, #tpu.memory_space<vmem>>, vector<4x4xf32>
    %21 = arith.mulf %13, %13 : vector<4x4xf32>
    %22 = arith.addf %20, %21 : vector<4x4xf32>
    %c0_11 = arith.constant 0 : index
    %c0_12 = arith.constant 0 : index
    %23 = vector.load %arg4[%c0_11, %c0_12] : memref<4x4xf32, #tpu.memory_space<vmem>>, vector<4x4xf32>
    tpu.vector_store %arg4[%c0_11, %c0_12], %22 {strides = array<i32>} : memref<4x4xf32, #tpu.memory_space<vmem>>, vector<4x4xf32>,
    %c1_i32 = arith.constant 1 : i32
    %24 = arith.cmpi eq, %arg0, %c1_i32 : i32
    %25 = arith.extui %24 : i1 to i32
    %c0_i32_13 = arith.constant 0 : i32
    %26 = arith.cmpi ne, %25, %c0_i32_13 : i32
    scf.if %26 {
      %c0_14 = arith.constant 0 : index
      %c0_15 = arith.constant 0 : index
      %27 = vector.load %arg3[%c0_14, %c0_15] : memref<4x4xf32, #tpu.memory_space<vmem>>, vector<4x4xf32>
      %cst_16 = arith.constant 2.000000e+00 : f32
      %28 = vector.broadcast %cst_16 : f32 to vector<4x4xf32>
      %29 = arith.divf %27, %28 : vector<4x4xf32>
      %c0_17 = arith.constant 0 : index
      %c0_18 = arith.constant 0 : index
      %30 = vector.load %arg4[%c0_17, %c0_18] : memref<4x4xf32, #tpu.memory_space<vmem>>, vector<4x4xf32>
      %cst_19 = arith.constant 2.000000e+00 : f32
      %31 = vector.broadcast %cst_19 : f32 to vector<4x4xf32>
      %32 = arith.mulf %31, %29 : vector<4x4xf32>
      %33 = arith.mulf %32, %29 : vector<4x4xf32>
      %34 = arith.subf %30, %33 : vector<4x4xf32>
      %cst_20 = arith.constant 1.000000e+00 : f32
      %35 = vector.broadcast %cst_20 : f32 to vector<4x4xf32>
      %36 = arith.divf %34, %35 : vector<4x4xf32>
      %cst_21 = arith.constant 0.000000e+00 : f32
      %37 = vector.broadcast %cst_21 : f32 to vector<4x4xf32>
      %38 = arith.maximumf %36, %37 : vector<4x4xf32>
      %39 = math.sqrt %38 : vector<4x4xf32>
      %cst_22 = arith.constant dense<0.000000e+00> : vector<4xf32>
      %40 = vector.multi_reduction <add>, %39, %cst_22 [0] : vector<4x4xf32> to vector<4xf32>
      %41 = vector.shape_cast %40 : vector<4xf32> to vector<1x4xf32>
      %cst_23 = arith.constant dense<0.000000e+00> : vector<1xf32>
      %42 = vector.multi_reduction <add>, %41, %cst_23 [1] : vector<1x4xf32> to vector<1xf32>
      %43 = vector.shape_cast %42 : vector<1xf32> to vector<1x1xf32>
      %cst_24 = arith.constant 1.600000e+01 : f32
      %44 = vector.broadcast %cst_24 : f32 to vector<1x1xf32>
      %45 = arith.divf %43, %44 : vector<1x1xf32>
      %cst_25 = arith.constant 1.562500e+00 : f32
      %46 = vector.broadcast %cst_25 : f32 to vector<1x1xf32>
      %47 = arith.mulf %45, %46 : vector<1x1xf32>
      %cst_26 = arith.constant 1.000000e+02 : f32
      %48 = vector.broadcast %cst_26 : f32 to vector<1x1xf32>
      %49 = arith.mulf %47, %48 : vector<1x1xf32>
      %c0_27 = arith.constant 0 : index
      %c0_28 = arith.constant 0 : index
      %50 = vector.load %arg2[%c0_27, %c0_28] : memref<1x1xf32, #tpu.memory_space<vmem>>, vector<1x1xf32>
      tpu.vector_store %arg2[%c0_27, %c0_28], %49 {strides = array<i32>} : memref<1x1xf32, #tpu.memory_space<vmem>>, vector<1x1xf32>,
    } else {
    }
    return
  }
  func.func @transform_0(%arg0: i32) -> (i32, i32, i32) {
    %c0_i32 = arith.constant 0 : i32
    %c0_i32_0 = arith.constant 0 : i32
    %c0_i32_1 = arith.constant 0 : i32
    return %arg0, %c0_i32, %c0_i32_0 : i32, i32, i32
  }
  func.func @transform_1(%arg0: i32) -> (i32, i32) {
    %c0_i32 = arith.constant 0 : i32
    %c0_i32_0 = arith.constant 0 : i32
    %c0_i32_1 = arith.constant 0 : i32
    return %c0_i32, %c0_i32_0 : i32, i32
  }
}

module attributes {stable_mosaic.version = 11 : i64} {
  func.func @_contrastive_ce_kernel(%arg0: i32, %arg1: i32, %arg2: memref<8x32xf32, #tpu.memory_space<vmem>>, %arg3: memref<8x32xf32, #tpu.memory_space<vmem>>, %arg4: memref<8x32xf32, #tpu.memory_space<vmem>>, %arg5: memref<8x32xf32, #tpu.memory_space<vmem>>, %arg6: memref<8x1xf32, #tpu.memory_space<vmem>>, %arg7: memref<8x1xf32, #tpu.memory_space<vmem>>, %arg8: memref<8x1xf32, #tpu.memory_space<vmem>>, %arg9: memref<8x1xf32, #tpu.memory_space<vmem>>, %arg10: memref<8x1xf32, #tpu.memory_space<vmem>>, %arg11: memref<8x1xf32, #tpu.memory_space<vmem>>, %arg12: memref<8x1xf32, #tpu.memory_space<vmem>>) attributes {dimension_semantics = [#tpu.dimension_semantics<parallel>, #tpu.dimension_semantics<arbitrary>], iteration_bounds = array<i64: 1, 1>, scalar_prefetch = 0 : i64, scratch_operands = 6 : i64, tpu.core_type = #tpu.core_type<tc>, window_params = [{transform_indices = @transform_0, window_bounds = array<i64: 8, 32>}, {transform_indices = @transform_1, window_bounds = array<i64: 8, 32>}, {transform_indices = @transform_2, window_bounds = array<i64: 8, 32>}, {transform_indices = @transform_3, window_bounds = array<i64: 8, 32>}, {transform_indices = @transform_4, window_bounds = array<i64: 8, 1>}]} {
    %c0_i32 = arith.constant 0 : i32
    %0 = arith.cmpi eq, %arg1, %c0_i32 : i32
    %1 = arith.extui %0 : i1 to i32
    %c0_i32_0 = arith.constant 0 : i32
    %2 = arith.cmpi ne, %1, %c0_i32_0 : i32
    scf.if %2 {
      %cst_52 = arith.constant 0xFF800000 : f32
      %85 = vector.broadcast %cst_52 : f32 to vector<8x1xf32>
      %c0_53 = arith.constant 0 : index
      %c0_54 = arith.constant 0 : index
      %86 = vector.load %arg7[%c0_53, %c0_54] : memref<8x1xf32, #tpu.memory_space<vmem>>, vector<8x1xf32>
      tpu.vector_store %arg7[%c0_53, %c0_54], %85 {strides = array<i32>} : memref<8x1xf32, #tpu.memory_space<vmem>>, vector<8x1xf32>,
      %c0_55 = arith.constant 0 : index
      %c0_56 = arith.constant 0 : index
      %87 = vector.load %arg10[%c0_55, %c0_56] : memref<8x1xf32, #tpu.memory_space<vmem>>, vector<8x1xf32>
      tpu.vector_store %arg10[%c0_55, %c0_56], %85 {strides = array<i32>} : memref<8x1xf32, #tpu.memory_space<vmem>>, vector<8x1xf32>,
      %cst_57 = arith.constant 0.000000e+00 : f32
      %88 = vector.broadcast %cst_57 : f32 to vector<8x1xf32>
      %c0_58 = arith.constant 0 : index
      %c0_59 = arith.constant 0 : index
      %89 = vector.load %arg8[%c0_58, %c0_59] : memref<8x1xf32, #tpu.memory_space<vmem>>, vector<8x1xf32>
      tpu.vector_store %arg8[%c0_58, %c0_59], %88 {strides = array<i32>} : memref<8x1xf32, #tpu.memory_space<vmem>>, vector<8x1xf32>,
      %cst_60 = arith.constant 0.000000e+00 : f32
      %90 = vector.broadcast %cst_60 : f32 to vector<8x1xf32>
      %c0_61 = arith.constant 0 : index
      %c0_62 = arith.constant 0 : index
      %91 = vector.load %arg11[%c0_61, %c0_62] : memref<8x1xf32, #tpu.memory_space<vmem>>, vector<8x1xf32>
      tpu.vector_store %arg11[%c0_61, %c0_62], %90 {strides = array<i32>} : memref<8x1xf32, #tpu.memory_space<vmem>>, vector<8x1xf32>,
      %cst_63 = arith.constant 0.000000e+00 : f32
      %92 = vector.broadcast %cst_63 : f32 to vector<8x1xf32>
      %c0_64 = arith.constant 0 : index
      %c0_65 = arith.constant 0 : index
      %93 = vector.load %arg9[%c0_64, %c0_65] : memref<8x1xf32, #tpu.memory_space<vmem>>, vector<8x1xf32>
      tpu.vector_store %arg9[%c0_64, %c0_65], %92 {strides = array<i32>} : memref<8x1xf32, #tpu.memory_space<vmem>>, vector<8x1xf32>,
      %cst_66 = arith.constant 0.000000e+00 : f32
      %94 = vector.broadcast %cst_66 : f32 to vector<8x1xf32>
      %c0_67 = arith.constant 0 : index
      %c0_68 = arith.constant 0 : index
      %95 = vector.load %arg12[%c0_67, %c0_68] : memref<8x1xf32, #tpu.memory_space<vmem>>, vector<8x1xf32>
      tpu.vector_store %arg12[%c0_67, %c0_68], %94 {strides = array<i32>} : memref<8x1xf32, #tpu.memory_space<vmem>>, vector<8x1xf32>,
    } else {
    }
    %c0 = arith.constant 0 : index
    %c0_1 = arith.constant 0 : index
    %3 = vector.load %arg2[%c0, %c0_1] : memref<8x32xf32, #tpu.memory_space<vmem>>, vector<8x32xf32>
    %c0_2 = arith.constant 0 : index
    %c0_3 = arith.constant 0 : index
    %4 = vector.load %arg4[%c0_2, %c0_3] : memref<8x32xf32, #tpu.memory_space<vmem>>, vector<8x32xf32>
    %cst = arith.constant dense<0.000000e+00> : vector<8x8xf32>
    %5 = tpu.matmul %3, %4, %cst {dimension_numbers = #tpu.dot_dimension_numbers<[1], [1], [0], [0], [0, 0, 1, 0], [], []>} : vector<8x32xf32>, vector<8x32xf32>, vector<8x8xf32> -> vector<8x8xf32>
    %c0_4 = arith.constant 0 : index
    %c0_5 = arith.constant 0 : index
    %6 = vector.load %arg3[%c0_4, %c0_5] : memref<8x32xf32, #tpu.memory_space<vmem>>, vector<8x32xf32>
    %c0_6 = arith.constant 0 : index
    %c0_7 = arith.constant 0 : index
    %7 = vector.load %arg5[%c0_6, %c0_7] : memref<8x32xf32, #tpu.memory_space<vmem>>, vector<8x32xf32>
    %cst_8 = arith.constant dense<0.000000e+00> : vector<8x8xf32>
    %8 = tpu.matmul %6, %7, %cst_8 {dimension_numbers = #tpu.dot_dimension_numbers<[1], [1], [0], [0], [0, 0, 1, 0], [], []>} : vector<8x32xf32>, vector<8x32xf32>, vector<8x8xf32> -> vector<8x8xf32>
    %c8_i32 = arith.constant 8 : i32
    %9 = arith.muli %arg0, %c8_i32 : i32
    %10 = tpu.iota {dimensions = array<i32: 0>} : vector<8x8xi32>
    %11 = vector.broadcast %9 : i32 to vector<8x8xi32>
    %12 = arith.addi %11, %10 : vector<8x8xi32>
    %c8_i32_9 = arith.constant 8 : i32
    %13 = arith.muli %arg1, %c8_i32_9 : i32
    %14 = tpu.iota {dimensions = array<i32: 1>} : vector<8x8xi32>
    %15 = vector.broadcast %13 : i32 to vector<8x8xi32>
    %16 = arith.addi %15, %14 : vector<8x8xi32>
    %c4_i32 = arith.constant 4 : i32
    %c0_i32_10 = arith.constant 0 : i32
    %17 = arith.cmpi eq, %c4_i32, %c0_i32_10 : i32
    %c1_i32 = arith.constant 1 : i32
    %18 = arith.select %17, %c1_i32, %c4_i32 : i32
    %19 = vector.broadcast %18 : i32 to vector<8x8xi32>
    %20 = arith.remsi %12, %19 : vector<8x8xi32>
    %c0_i32_11 = arith.constant 0 : i32
    %21 = vector.broadcast %c0_i32_11 : i32 to vector<8x8xi32>
    %22 = arith.cmpi ne, %20, %21 : vector<8x8xi32>
    %c0_i32_12 = arith.constant 0 : i32
    %23 = vector.broadcast %c0_i32_12 : i32 to vector<8x8xi32>
    %24 = arith.cmpi slt, %20, %23 : vector<8x8xi32>
    %c0_i32_13 = arith.constant 0 : i32
    %25 = arith.cmpi slt, %18, %c0_i32_13 : i32
    %26 = vector.broadcast %25 : i1 to vector<8x8xi1>
    %27 = vector.broadcast %26 : vector<8x8xi1> to vector<8x8xi1>
    %28 = arith.xori %24, %27 : vector<8x8xi1>
    %29 = arith.andi %28, %22 : vector<8x8xi1>
    %30 = vector.broadcast %18 : i32 to vector<8x8xi32>
    %31 = arith.addi %20, %30 : vector<8x8xi32>
    %32 = arith.select %29, %31, %20 : vector<8x8xi1>, vector<8x8xi32>
    %33 = arith.cmpi eq, %16, %32 : vector<8x8xi32>
    %c0_14 = arith.constant 0 : index
    %c0_15 = arith.constant 0 : index
    %34 = vector.load %arg9[%c0_14, %c0_15] : memref<8x1xf32, #tpu.memory_space<vmem>>, vector<8x1xf32>
    %cst_16 = arith.constant 0.000000e+00 : f32
    %35 = vector.broadcast %cst_16 : f32 to vector<8x8xf32>
    %36 = arith.select %33, %5, %35 : vector<8x8xi1>, vector<8x8xf32>
    %cst_17 = arith.constant dense<0.000000e+00> : vector<8xf32>
    %37 = vector.multi_reduction <add>, %36, %cst_17 [1] : vector<8x8xf32> to vector<8xf32>
    %38 = vector.shape_cast %37 : vector<8xf32> to vector<8x1xf32>
    %39 = arith.addf %34, %38 : vector<8x1xf32>
    %c0_18 = arith.constant 0 : index
    %c0_19 = arith.constant 0 : index
    %40 = vector.load %arg9[%c0_18, %c0_19] : memref<8x1xf32, #tpu.memory_space<vmem>>, vector<8x1xf32>
    tpu.vector_store %arg9[%c0_18, %c0_19], %39 {strides = array<i32>} : memref<8x1xf32, #tpu.memory_space<vmem>>, vector<8x1xf32>,
    %c0_20 = arith.constant 0 : index
    %c0_21 = arith.constant 0 : index
    %41 = vector.load %arg12[%c0_20, %c0_21] : memref<8x1xf32, #tpu.memory_space<vmem>>, vector<8x1xf32>
    %cst_22 = arith.constant 0.000000e+00 : f32
    %42 = vector.broadcast %cst_22 : f32 to vector<8x8xf32>
    %43 = arith.select %33, %8, %42 : vector<8x8xi1>, vector<8x8xf32>
    %cst_23 = arith.constant dense<0.000000e+00> : vector<8xf32>
    %44 = vector.multi_reduction <add>, %43, %cst_23 [1] : vector<8x8xf32> to vector<8xf32>
    %45 = vector.shape_cast %44 : vector<8xf32> to vector<8x1xf32>
    %46 = arith.addf %41, %45 : vector<8x1xf32>
    %c0_24 = arith.constant 0 : index
    %c0_25 = arith.constant 0 : index
    %47 = vector.load %arg12[%c0_24, %c0_25] : memref<8x1xf32, #tpu.memory_space<vmem>>, vector<8x1xf32>
    tpu.vector_store %arg12[%c0_24, %c0_25], %46 {strides = array<i32>} : memref<8x1xf32, #tpu.memory_space<vmem>>, vector<8x1xf32>,
    %c0_26 = arith.constant 0 : index
    %c0_27 = arith.constant 0 : index
    %48 = vector.load %arg7[%c0_26, %c0_27] : memref<8x1xf32, #tpu.memory_space<vmem>>, vector<8x1xf32>
    %cst_28 = arith.constant dense<0xFF800000> : vector<8xf32>
    %49 = vector.multi_reduction <maximumf>, %5, %cst_28 [1] : vector<8x8xf32> to vector<8xf32>
    %50 = vector.shape_cast %49 : vector<8xf32> to vector<8x1xf32>
    %51 = arith.maximumf %48, %50 : vector<8x1xf32>
    %c0_29 = arith.constant 0 : index
    %c0_30 = arith.constant 0 : index
    %52 = vector.load %arg8[%c0_29, %c0_30] : memref<8x1xf32, #tpu.memory_space<vmem>>, vector<8x1xf32>
    %c0_31 = arith.constant 0 : index
    %c0_32 = arith.constant 0 : index
    %53 = vector.load %arg7[%c0_31, %c0_32] : memref<8x1xf32, #tpu.memory_space<vmem>>, vector<8x1xf32>
    %54 = arith.subf %53, %51 : vector<8x1xf32>
    %55 = math.exp %54 : vector<8x1xf32>
    %56 = arith.mulf %52, %55 : vector<8x1xf32>
    %57 = vector.broadcast %51 : vector<8x1xf32> to vector<8x8xf32>
    %58 = arith.subf %5, %57 : vector<8x8xf32>
    %59 = math.exp %58 : vector<8x8xf32>
    %cst_33 = arith.constant dense<0.000000e+00> : vector<8xf32>
    %60 = vector.multi_reduction <add>, %59, %cst_33 [1] : vector<8x8xf32> to vector<8xf32>
    %61 = vector.shape_cast %60 : vector<8xf32> to vector<8x1xf32>
    %62 = arith.addf %56, %61 : vector<8x1xf32>
    %c0_34 = arith.constant 0 : index
    %c0_35 = arith.constant 0 : index
    %63 = vector.load %arg8[%c0_34, %c0_35] : memref<8x1xf32, #tpu.memory_space<vmem>>, vector<8x1xf32>
    tpu.vector_store %arg8[%c0_34, %c0_35], %62 {strides = array<i32>} : memref<8x1xf32, #tpu.memory_space<vmem>>, vector<8x1xf32>,
    %c0_36 = arith.constant 0 : index
    %c0_37 = arith.constant 0 : index
    %64 = vector.load %arg7[%c0_36, %c0_37] : memref<8x1xf32, #tpu.memory_space<vmem>>, vector<8x1xf32>
    tpu.vector_store %arg7[%c0_36, %c0_37], %51 {strides = array<i32>} : memref<8x1xf32, #tpu.memory_space<vmem>>, vector<8x1xf32>,
    %c0_38 = arith.constant 0 : index
    %c0_39 = arith.constant 0 : index
    %65 = vector.load %arg10[%c0_38, %c0_39] : memref<8x1xf32, #tpu.memory_space<vmem>>, vector<8x1xf32>
    %cst_40 = arith.constant dense<0xFF800000> : vector<8xf32>
    %66 = vector.multi_reduction <maximumf>, %8, %cst_40 [1] : vector<8x8xf32> to vector<8xf32>
    %67 = vector.shape_cast %66 : vector<8xf32> to vector<8x1xf32>
    %68 = arith.maximumf %65, %67 : vector<8x1xf32>
    %c0_41 = arith.constant 0 : index
    %c0_42 = arith.constant 0 : index
    %69 = vector.load %arg11[%c0_41, %c0_42] : memref<8x1xf32, #tpu.memory_space<vmem>>, vector<8x1xf32>
    %c0_43 = arith.constant 0 : index
    %c0_44 = arith.constant 0 : index
    %70 = vector.load %arg10[%c0_43, %c0_44] : memref<8x1xf32, #tpu.memory_space<vmem>>, vector<8x1xf32>
    %71 = arith.subf %70, %68 : vector<8x1xf32>
    %72 = math.exp %71 : vector<8x1xf32>
    %73 = arith.mulf %69, %72 : vector<8x1xf32>
    %74 = vector.broadcast %68 : vector<8x1xf32> to vector<8x8xf32>
    %75 = arith.subf %8, %74 : vector<8x8xf32>
    %76 = math.exp %75 : vector<8x8xf32>
    %cst_45 = arith.constant dense<0.000000e+00> : vector<8xf32>
    %77 = vector.multi_reduction <add>, %76, %cst_45 [1] : vector<8x8xf32> to vector<8xf32>
    %78 = vector.shape_cast %77 : vector<8xf32> to vector<8x1xf32>
    %79 = arith.addf %73, %78 : vector<8x1xf32>
    %c0_46 = arith.constant 0 : index
    %c0_47 = arith.constant 0 : index
    %80 = vector.load %arg11[%c0_46, %c0_47] : memref<8x1xf32, #tpu.memory_space<vmem>>, vector<8x1xf32>
    tpu.vector_store %arg11[%c0_46, %c0_47], %79 {strides = array<i32>} : memref<8x1xf32, #tpu.memory_space<vmem>>, vector<8x1xf32>,
    %c0_48 = arith.constant 0 : index
    %c0_49 = arith.constant 0 : index
    %81 = vector.load %arg10[%c0_48, %c0_49] : memref<8x1xf32, #tpu.memory_space<vmem>>, vector<8x1xf32>
    tpu.vector_store %arg10[%c0_48, %c0_49], %68 {strides = array<i32>} : memref<8x1xf32, #tpu.memory_space<vmem>>, vector<8x1xf32>,
    %c0_i32_50 = arith.constant 0 : i32
    %82 = arith.cmpi eq, %arg1, %c0_i32_50 : i32
    %83 = arith.extui %82 : i1 to i32
    %c0_i32_51 = arith.constant 0 : i32
    %84 = arith.cmpi ne, %83, %c0_i32_51 : i32
    scf.if %84 {
      %c0_52 = arith.constant 0 : index
      %c0_53 = arith.constant 0 : index
      %85 = vector.load %arg7[%c0_52, %c0_53] : memref<8x1xf32, #tpu.memory_space<vmem>>, vector<8x1xf32>
      %c0_54 = arith.constant 0 : index
      %c0_55 = arith.constant 0 : index
      %86 = vector.load %arg8[%c0_54, %c0_55] : memref<8x1xf32, #tpu.memory_space<vmem>>, vector<8x1xf32>
      %87 = math.log %86 : vector<8x1xf32>
      %88 = arith.addf %85, %87 : vector<8x1xf32>
      %c0_56 = arith.constant 0 : index
      %c0_57 = arith.constant 0 : index
      %89 = vector.load %arg10[%c0_56, %c0_57] : memref<8x1xf32, #tpu.memory_space<vmem>>, vector<8x1xf32>
      %c0_58 = arith.constant 0 : index
      %c0_59 = arith.constant 0 : index
      %90 = vector.load %arg11[%c0_58, %c0_59] : memref<8x1xf32, #tpu.memory_space<vmem>>, vector<8x1xf32>
      %91 = math.log %90 : vector<8x1xf32>
      %92 = arith.addf %89, %91 : vector<8x1xf32>
      %c0_60 = arith.constant 0 : index
      %c0_61 = arith.constant 0 : index
      %93 = vector.load %arg9[%c0_60, %c0_61] : memref<8x1xf32, #tpu.memory_space<vmem>>, vector<8x1xf32>
      %94 = arith.subf %88, %93 : vector<8x1xf32>
      %c0_62 = arith.constant 0 : index
      %c0_63 = arith.constant 0 : index
      %95 = vector.load %arg12[%c0_62, %c0_63] : memref<8x1xf32, #tpu.memory_space<vmem>>, vector<8x1xf32>
      %96 = arith.subf %92, %95 : vector<8x1xf32>
      %97 = arith.addf %94, %96 : vector<8x1xf32>
      %c0_64 = arith.constant 0 : index
      %c0_65 = arith.constant 0 : index
      %98 = vector.load %arg6[%c0_64, %c0_65] : memref<8x1xf32, #tpu.memory_space<vmem>>, vector<8x1xf32>
      tpu.vector_store %arg6[%c0_64, %c0_65], %97 {strides = array<i32>} : memref<8x1xf32, #tpu.memory_space<vmem>>, vector<8x1xf32>,
    } else {
    }
    return
  }
  func.func @transform_0(%arg0: i32, %arg1: i32) -> (i32, i32) {
    %c0_i32 = arith.constant 0 : i32
    %c0_i32_0 = arith.constant 0 : i32
    return %arg0, %c0_i32 : i32, i32
  }
  func.func @transform_1(%arg0: i32, %arg1: i32) -> (i32, i32) {
    %c0_i32 = arith.constant 0 : i32
    %c0_i32_0 = arith.constant 0 : i32
    return %arg0, %c0_i32 : i32, i32
  }
  func.func @transform_2(%arg0: i32, %arg1: i32) -> (i32, i32) {
    %c0_i32 = arith.constant 0 : i32
    %c0_i32_0 = arith.constant 0 : i32
    return %arg1, %c0_i32 : i32, i32
  }
  func.func @transform_3(%arg0: i32, %arg1: i32) -> (i32, i32) {
    %c0_i32 = arith.constant 0 : i32
    %c0_i32_0 = arith.constant 0 : i32
    return %arg1, %c0_i32 : i32, i32
  }
  func.func @transform_4(%arg0: i32, %arg1: i32) -> (i32, i32) {
    %c0_i32 = arith.constant 0 : i32
    %c0_i32_0 = arith.constant 0 : i32
    return %arg0, %c0_i32 : i32, i32
  }
}

module attributes {stable_mosaic.version = 11 : i64} {
  func.func @_contrastive_ce_kernel(%arg0: i32, %arg1: i32, %arg2: memref<8x32xf32, #tpu.memory_space<vmem>>, %arg3: memref<8x32xf32, #tpu.memory_space<vmem>>, %arg4: memref<8x32xf32, #tpu.memory_space<vmem>>, %arg5: memref<8x32xf32, #tpu.memory_space<vmem>>, %arg6: memref<8x1xf32, #tpu.memory_space<vmem>>, %arg7: memref<8x1xf32, #tpu.memory_space<vmem>>, %arg8: memref<8x1xf32, #tpu.memory_space<vmem>>, %arg9: memref<8x1xf32, #tpu.memory_space<vmem>>, %arg10: memref<8x1xf32, #tpu.memory_space<vmem>>, %arg11: memref<8x1xf32, #tpu.memory_space<vmem>>, %arg12: memref<8x1xf32, #tpu.memory_space<vmem>>) attributes {dimension_semantics = [#tpu.dimension_semantics<parallel>, #tpu.dimension_semantics<arbitrary>], iteration_bounds = array<i64: 1, 1>, scalar_prefetch = 0 : i64, scratch_operands = 6 : i64, tpu.core_type = #tpu.core_type<tc>, window_params = [{transform_indices = @transform_0, window_bounds = array<i64: 8, 32>}, {transform_indices = @transform_1, window_bounds = array<i64: 8, 32>}, {transform_indices = @transform_2, window_bounds = array<i64: 8, 32>}, {transform_indices = @transform_3, window_bounds = array<i64: 8, 32>}, {transform_indices = @transform_4, window_bounds = array<i64: 8, 1>}]} {
    %c0_i32 = arith.constant 0 : i32
    %0 = arith.cmpi eq, %arg1, %c0_i32 : i32
    %1 = arith.extui %0 : i1 to i32
    %c0_i32_0 = arith.constant 0 : i32
    %2 = arith.cmpi ne, %1, %c0_i32_0 : i32
    scf.if %2 {
      %cst_52 = arith.constant 0xFF800000 : f32
      %85 = vector.broadcast %cst_52 : f32 to vector<8x1xf32>
      %c0_53 = arith.constant 0 : index
      %c0_54 = arith.constant 0 : index
      %86 = vector.load %arg7[%c0_53, %c0_54] : memref<8x1xf32, #tpu.memory_space<vmem>>, vector<8x1xf32>
      tpu.vector_store %arg7[%c0_53, %c0_54], %85 {strides = array<i32>} : memref<8x1xf32, #tpu.memory_space<vmem>>, vector<8x1xf32>,
      %c0_55 = arith.constant 0 : index
      %c0_56 = arith.constant 0 : index
      %87 = vector.load %arg10[%c0_55, %c0_56] : memref<8x1xf32, #tpu.memory_space<vmem>>, vector<8x1xf32>
      tpu.vector_store %arg10[%c0_55, %c0_56], %85 {strides = array<i32>} : memref<8x1xf32, #tpu.memory_space<vmem>>, vector<8x1xf32>,
      %cst_57 = arith.constant 0.000000e+00 : f32
      %88 = vector.broadcast %cst_57 : f32 to vector<8x1xf32>
      %c0_58 = arith.constant 0 : index
      %c0_59 = arith.constant 0 : index
      %89 = vector.load %arg8[%c0_58, %c0_59] : memref<8x1xf32, #tpu.memory_space<vmem>>, vector<8x1xf32>
      tpu.vector_store %arg8[%c0_58, %c0_59], %88 {strides = array<i32>} : memref<8x1xf32, #tpu.memory_space<vmem>>, vector<8x1xf32>,
      %cst_60 = arith.constant 0.000000e+00 : f32
      %90 = vector.broadcast %cst_60 : f32 to vector<8x1xf32>
      %c0_61 = arith.constant 0 : index
      %c0_62 = arith.constant 0 : index
      %91 = vector.load %arg11[%c0_61, %c0_62] : memref<8x1xf32, #tpu.memory_space<vmem>>, vector<8x1xf32>
      tpu.vector_store %arg11[%c0_61, %c0_62], %90 {strides = array<i32>} : memref<8x1xf32, #tpu.memory_space<vmem>>, vector<8x1xf32>,
      %cst_63 = arith.constant 0.000000e+00 : f32
      %92 = vector.broadcast %cst_63 : f32 to vector<8x1xf32>
      %c0_64 = arith.constant 0 : index
      %c0_65 = arith.constant 0 : index
      %93 = vector.load %arg9[%c0_64, %c0_65] : memref<8x1xf32, #tpu.memory_space<vmem>>, vector<8x1xf32>
      tpu.vector_store %arg9[%c0_64, %c0_65], %92 {strides = array<i32>} : memref<8x1xf32, #tpu.memory_space<vmem>>, vector<8x1xf32>,
      %cst_66 = arith.constant 0.000000e+00 : f32
      %94 = vector.broadcast %cst_66 : f32 to vector<8x1xf32>
      %c0_67 = arith.constant 0 : index
      %c0_68 = arith.constant 0 : index
      %95 = vector.load %arg12[%c0_67, %c0_68] : memref<8x1xf32, #tpu.memory_space<vmem>>, vector<8x1xf32>
      tpu.vector_store %arg12[%c0_67, %c0_68], %94 {strides = array<i32>} : memref<8x1xf32, #tpu.memory_space<vmem>>, vector<8x1xf32>,
    } else {
    }
    %c0 = arith.constant 0 : index
    %c0_1 = arith.constant 0 : index
    %3 = vector.load %arg2[%c0, %c0_1] : memref<8x32xf32, #tpu.memory_space<vmem>>, vector<8x32xf32>
    %c0_2 = arith.constant 0 : index
    %c0_3 = arith.constant 0 : index
    %4 = vector.load %arg4[%c0_2, %c0_3] : memref<8x32xf32, #tpu.memory_space<vmem>>, vector<8x32xf32>
    %cst = arith.constant dense<0.000000e+00> : vector<8x8xf32>
    %5 = tpu.matmul %3, %4, %cst {dimension_numbers = #tpu.dot_dimension_numbers<[1], [1], [0], [0], [0, 0, 1, 0], [], []>} : vector<8x32xf32>, vector<8x32xf32>, vector<8x8xf32> -> vector<8x8xf32>
    %c0_4 = arith.constant 0 : index
    %c0_5 = arith.constant 0 : index
    %6 = vector.load %arg3[%c0_4, %c0_5] : memref<8x32xf32, #tpu.memory_space<vmem>>, vector<8x32xf32>
    %c0_6 = arith.constant 0 : index
    %c0_7 = arith.constant 0 : index
    %7 = vector.load %arg5[%c0_6, %c0_7] : memref<8x32xf32, #tpu.memory_space<vmem>>, vector<8x32xf32>
    %cst_8 = arith.constant dense<0.000000e+00> : vector<8x8xf32>
    %8 = tpu.matmul %6, %7, %cst_8 {dimension_numbers = #tpu.dot_dimension_numbers<[1], [1], [0], [0], [0, 0, 1, 0], [], []>} : vector<8x32xf32>, vector<8x32xf32>, vector<8x8xf32> -> vector<8x8xf32>
    %c8_i32 = arith.constant 8 : i32
    %9 = arith.muli %arg0, %c8_i32 : i32
    %10 = tpu.iota {dimensions = array<i32: 0>} : vector<8x8xi32>
    %11 = vector.broadcast %9 : i32 to vector<8x8xi32>
    %12 = arith.addi %11, %10 : vector<8x8xi32>
    %c8_i32_9 = arith.constant 8 : i32
    %13 = arith.muli %arg1, %c8_i32_9 : i32
    %14 = tpu.iota {dimensions = array<i32: 1>} : vector<8x8xi32>
    %15 = vector.broadcast %13 : i32 to vector<8x8xi32>
    %16 = arith.addi %15, %14 : vector<8x8xi32>
    %c4_i32 = arith.constant 4 : i32
    %c0_i32_10 = arith.constant 0 : i32
    %17 = arith.cmpi eq, %c4_i32, %c0_i32_10 : i32
    %c1_i32 = arith.constant 1 : i32
    %18 = arith.select %17, %c1_i32, %c4_i32 : i32
    %19 = vector.broadcast %18 : i32 to vector<8x8xi32>
    %20 = arith.remsi %12, %19 : vector<8x8xi32>
    %c0_i32_11 = arith.constant 0 : i32
    %21 = vector.broadcast %c0_i32_11 : i32 to vector<8x8xi32>
    %22 = arith.cmpi ne, %20, %21 : vector<8x8xi32>
    %c0_i32_12 = arith.constant 0 : i32
    %23 = vector.broadcast %c0_i32_12 : i32 to vector<8x8xi32>
    %24 = arith.cmpi slt, %20, %23 : vector<8x8xi32>
    %c0_i32_13 = arith.constant 0 : i32
    %25 = arith.cmpi slt, %18, %c0_i32_13 : i32
    %26 = vector.broadcast %25 : i1 to vector<8x8xi1>
    %27 = vector.broadcast %26 : vector<8x8xi1> to vector<8x8xi1>
    %28 = arith.xori %24, %27 : vector<8x8xi1>
    %29 = arith.andi %28, %22 : vector<8x8xi1>
    %30 = vector.broadcast %18 : i32 to vector<8x8xi32>
    %31 = arith.addi %20, %30 : vector<8x8xi32>
    %32 = arith.select %29, %31, %20 : vector<8x8xi1>, vector<8x8xi32>
    %33 = arith.cmpi eq, %16, %32 : vector<8x8xi32>
    %c0_14 = arith.constant 0 : index
    %c0_15 = arith.constant 0 : index
    %34 = vector.load %arg9[%c0_14, %c0_15] : memref<8x1xf32, #tpu.memory_space<vmem>>, vector<8x1xf32>
    %cst_16 = arith.constant 0.000000e+00 : f32
    %35 = vector.broadcast %cst_16 : f32 to vector<8x8xf32>
    %36 = arith.select %33, %5, %35 : vector<8x8xi1>, vector<8x8xf32>
    %cst_17 = arith.constant dense<0.000000e+00> : vector<8xf32>
    %37 = vector.multi_reduction <add>, %36, %cst_17 [1] : vector<8x8xf32> to vector<8xf32>
    %38 = vector.shape_cast %37 : vector<8xf32> to vector<8x1xf32>
    %39 = arith.addf %34, %38 : vector<8x1xf32>
    %c0_18 = arith.constant 0 : index
    %c0_19 = arith.constant 0 : index
    %40 = vector.load %arg9[%c0_18, %c0_19] : memref<8x1xf32, #tpu.memory_space<vmem>>, vector<8x1xf32>
    tpu.vector_store %arg9[%c0_18, %c0_19], %39 {strides = array<i32>} : memref<8x1xf32, #tpu.memory_space<vmem>>, vector<8x1xf32>,
    %c0_20 = arith.constant 0 : index
    %c0_21 = arith.constant 0 : index
    %41 = vector.load %arg12[%c0_20, %c0_21] : memref<8x1xf32, #tpu.memory_space<vmem>>, vector<8x1xf32>
    %cst_22 = arith.constant 0.000000e+00 : f32
    %42 = vector.broadcast %cst_22 : f32 to vector<8x8xf32>
    %43 = arith.select %33, %8, %42 : vector<8x8xi1>, vector<8x8xf32>
    %cst_23 = arith.constant dense<0.000000e+00> : vector<8xf32>
    %44 = vector.multi_reduction <add>, %43, %cst_23 [1] : vector<8x8xf32> to vector<8xf32>
    %45 = vector.shape_cast %44 : vector<8xf32> to vector<8x1xf32>
    %46 = arith.addf %41, %45 : vector<8x1xf32>
    %c0_24 = arith.constant 0 : index
    %c0_25 = arith.constant 0 : index
    %47 = vector.load %arg12[%c0_24, %c0_25] : memref<8x1xf32, #tpu.memory_space<vmem>>, vector<8x1xf32>
    tpu.vector_store %arg12[%c0_24, %c0_25], %46 {strides = array<i32>} : memref<8x1xf32, #tpu.memory_space<vmem>>, vector<8x1xf32>,
    %c0_26 = arith.constant 0 : index
    %c0_27 = arith.constant 0 : index
    %48 = vector.load %arg7[%c0_26, %c0_27] : memref<8x1xf32, #tpu.memory_space<vmem>>, vector<8x1xf32>
    %cst_28 = arith.constant dense<0xFF800000> : vector<8xf32>
    %49 = vector.multi_reduction <maximumf>, %5, %cst_28 [1] : vector<8x8xf32> to vector<8xf32>
    %50 = vector.shape_cast %49 : vector<8xf32> to vector<8x1xf32>
    %51 = arith.maximumf %48, %50 : vector<8x1xf32>
    %c0_29 = arith.constant 0 : index
    %c0_30 = arith.constant 0 : index
    %52 = vector.load %arg8[%c0_29, %c0_30] : memref<8x1xf32, #tpu.memory_space<vmem>>, vector<8x1xf32>
    %c0_31 = arith.constant 0 : index
    %c0_32 = arith.constant 0 : index
    %53 = vector.load %arg7[%c0_31, %c0_32] : memref<8x1xf32, #tpu.memory_space<vmem>>, vector<8x1xf32>
    %54 = arith.subf %53, %51 : vector<8x1xf32>
    %55 = math.exp %54 : vector<8x1xf32>
    %56 = arith.mulf %52, %55 : vector<8x1xf32>
    %57 = vector.broadcast %51 : vector<8x1xf32> to vector<8x8xf32>
    %58 = arith.subf %5, %57 : vector<8x8xf32>
    %59 = math.exp %58 : vector<8x8xf32>
    %cst_33 = arith.constant dense<0.000000e+00> : vector<8xf32>
    %60 = vector.multi_reduction <add>, %59, %cst_33 [1] : vector<8x8xf32> to vector<8xf32>
    %61 = vector.shape_cast %60 : vector<8xf32> to vector<8x1xf32>
    %62 = arith.addf %56, %61 : vector<8x1xf32>
    %c0_34 = arith.constant 0 : index
    %c0_35 = arith.constant 0 : index
    %63 = vector.load %arg8[%c0_34, %c0_35] : memref<8x1xf32, #tpu.memory_space<vmem>>, vector<8x1xf32>
    tpu.vector_store %arg8[%c0_34, %c0_35], %62 {strides = array<i32>} : memref<8x1xf32, #tpu.memory_space<vmem>>, vector<8x1xf32>,
    %c0_36 = arith.constant 0 : index
    %c0_37 = arith.constant 0 : index
    %64 = vector.load %arg7[%c0_36, %c0_37] : memref<8x1xf32, #tpu.memory_space<vmem>>, vector<8x1xf32>
    tpu.vector_store %arg7[%c0_36, %c0_37], %51 {strides = array<i32>} : memref<8x1xf32, #tpu.memory_space<vmem>>, vector<8x1xf32>,
    %c0_38 = arith.constant 0 : index
    %c0_39 = arith.constant 0 : index
    %65 = vector.load %arg10[%c0_38, %c0_39] : memref<8x1xf32, #tpu.memory_space<vmem>>, vector<8x1xf32>
    %cst_40 = arith.constant dense<0xFF800000> : vector<8xf32>
    %66 = vector.multi_reduction <maximumf>, %8, %cst_40 [1] : vector<8x8xf32> to vector<8xf32>
    %67 = vector.shape_cast %66 : vector<8xf32> to vector<8x1xf32>
    %68 = arith.maximumf %65, %67 : vector<8x1xf32>
    %c0_41 = arith.constant 0 : index
    %c0_42 = arith.constant 0 : index
    %69 = vector.load %arg11[%c0_41, %c0_42] : memref<8x1xf32, #tpu.memory_space<vmem>>, vector<8x1xf32>
    %c0_43 = arith.constant 0 : index
    %c0_44 = arith.constant 0 : index
    %70 = vector.load %arg10[%c0_43, %c0_44] : memref<8x1xf32, #tpu.memory_space<vmem>>, vector<8x1xf32>
    %71 = arith.subf %70, %68 : vector<8x1xf32>
    %72 = math.exp %71 : vector<8x1xf32>
    %73 = arith.mulf %69, %72 : vector<8x1xf32>
    %74 = vector.broadcast %68 : vector<8x1xf32> to vector<8x8xf32>
    %75 = arith.subf %8, %74 : vector<8x8xf32>
    %76 = math.exp %75 : vector<8x8xf32>
    %cst_45 = arith.constant dense<0.000000e+00> : vector<8xf32>
    %77 = vector.multi_reduction <add>, %76, %cst_45 [1] : vector<8x8xf32> to vector<8xf32>
    %78 = vector.shape_cast %77 : vector<8xf32> to vector<8x1xf32>
    %79 = arith.addf %73, %78 : vector<8x1xf32>
    %c0_46 = arith.constant 0 : index
    %c0_47 = arith.constant 0 : index
    %80 = vector.load %arg11[%c0_46, %c0_47] : memref<8x1xf32, #tpu.memory_space<vmem>>, vector<8x1xf32>
    tpu.vector_store %arg11[%c0_46, %c0_47], %79 {strides = array<i32>} : memref<8x1xf32, #tpu.memory_space<vmem>>, vector<8x1xf32>,
    %c0_48 = arith.constant 0 : index
    %c0_49 = arith.constant 0 : index
    %81 = vector.load %arg10[%c0_48, %c0_49] : memref<8x1xf32, #tpu.memory_space<vmem>>, vector<8x1xf32>
    tpu.vector_store %arg10[%c0_48, %c0_49], %68 {strides = array<i32>} : memref<8x1xf32, #tpu.memory_space<vmem>>, vector<8x1xf32>,
    %c0_i32_50 = arith.constant 0 : i32
    %82 = arith.cmpi eq, %arg1, %c0_i32_50 : i32
    %83 = arith.extui %82 : i1 to i32
    %c0_i32_51 = arith.constant 0 : i32
    %84 = arith.cmpi ne, %83, %c0_i32_51 : i32
    scf.if %84 {
      %c0_52 = arith.constant 0 : index
      %c0_53 = arith.constant 0 : index
      %85 = vector.load %arg7[%c0_52, %c0_53] : memref<8x1xf32, #tpu.memory_space<vmem>>, vector<8x1xf32>
      %c0_54 = arith.constant 0 : index
      %c0_55 = arith.constant 0 : index
      %86 = vector.load %arg8[%c0_54, %c0_55] : memref<8x1xf32, #tpu.memory_space<vmem>>, vector<8x1xf32>
      %87 = math.log %86 : vector<8x1xf32>
      %88 = arith.addf %85, %87 : vector<8x1xf32>
      %c0_56 = arith.constant 0 : index
      %c0_57 = arith.constant 0 : index
      %89 = vector.load %arg10[%c0_56, %c0_57] : memref<8x1xf32, #tpu.memory_space<vmem>>, vector<8x1xf32>
      %c0_58 = arith.constant 0 : index
      %c0_59 = arith.constant 0 : index
      %90 = vector.load %arg11[%c0_58, %c0_59] : memref<8x1xf32, #tpu.memory_space<vmem>>, vector<8x1xf32>
      %91 = math.log %90 : vector<8x1xf32>
      %92 = arith.addf %89, %91 : vector<8x1xf32>
      %c0_60 = arith.constant 0 : index
      %c0_61 = arith.constant 0 : index
      %93 = vector.load %arg9[%c0_60, %c0_61] : memref<8x1xf32, #tpu.memory_space<vmem>>, vector<8x1xf32>
      %94 = arith.subf %88, %93 : vector<8x1xf32>
      %c0_62 = arith.constant 0 : index
      %c0_63 = arith.constant 0 : index
      %95 = vector.load %arg12[%c0_62, %c0_63] : memref<8x1xf32, #tpu.memory_space<vmem>>, vector<8x1xf32>
      %96 = arith.subf %92, %95 : vector<8x1xf32>
      %97 = arith.addf %94, %96 : vector<8x1xf32>
      %c0_64 = arith.constant 0 : index
      %c0_65 = arith.constant 0 : index
      %98 = vector.load %arg6[%c0_64, %c0_65] : memref<8x1xf32, #tpu.memory_space<vmem>>, vector<8x1xf32>
      tpu.vector_store %arg6[%c0_64, %c0_65], %97 {strides = array<i32>} : memref<8x1xf32, #tpu.memory_space<vmem>>, vector<8x1xf32>,
    } else {
    }
    return
  }
  func.func @transform_0(%arg0: i32, %arg1: i32) -> (i32, i32) {
    %c0_i32 = arith.constant 0 : i32
    %c0_i32_0 = arith.constant 0 : i32
    return %arg0, %c0_i32 : i32, i32
  }
  func.func @transform_1(%arg0: i32, %arg1: i32) -> (i32, i32) {
    %c0_i32 = arith.constant 0 : i32
    %c0_i32_0 = arith.constant 0 : i32
    return %arg0, %c0_i32 : i32, i32
  }
  func.func @transform_2(%arg0: i32, %arg1: i32) -> (i32, i32) {
    %c0_i32 = arith.constant 0 : i32
    %c0_i32_0 = arith.constant 0 : i32
    return %arg1, %c0_i32 : i32, i32
  }
  func.func @transform_3(%arg0: i32, %arg1: i32) -> (i32, i32) {
    %c0_i32 = arith.constant 0 : i32
    %c0_i32_0 = arith.constant 0 : i32
    return %arg1, %c0_i32 : i32, i32
  }
  func.func @transform_4(%arg0: i32, %arg1: i32) -> (i32, i32) {
    %c0_i32 = arith.constant 0 : i32
    %c0_i32_0 = arith.constant 0 : i32
    return %arg0, %c0_i32 : i32, i32
  }
}

</mosaic_0001>

<bundles_post_ra>
// kernel: my_loss_ablation_2c.4
= control target key start
LH: loop header
LB: loop body
LE: loop exit
PB: predicated region body
PF: predicated region fallthrough
CT: control target
= control target key end

     0   :  { %6 = vsyncpa [#allocation5], 0  ;;  %s379_s6 = smov 0   ;;  %s425_s0 = inlined_call_operand.vmem [shape: f32[2,4,32], index: 0, kind: input, shape index: {}]   ;;  %s426_s1 = inlined_call_operand.hbm [shape: f32[1,1], index: 1, kind: output, shape index: {}]  }
   0x1 LB: > { %s385_s7 = sadd.s32 4294967295, %s363_s6   ;;  %p288_p0 = scmp.ge.s32.totalorder %s363_s6, 1  ;;  %s363_s6 = sphi %s379_s6, %s12_s6  }
   0x2   : > { %p82_p1 = scmp.lt.s32.totalorder %s363_s6, 3 }
   0x4   : > { %p83_p2 = pnand %p288_p0, %p82_p1 }
   0x5   : > { %p96_p3 = scmp.lt.s32.totalorder (!%p83_p2), %s385_s7, 1  ;;  %vm102_vm0 = vcmask (!%p83_p2), 257024   ;;  %v365_v3 = vmov (!%p83_p2), 0.0   ;;  %vm366_vm1 = vmmov (!%p83_p2), 0   ;;  %vm108_vm2 = vcmask (!%p83_p2), 261120   ;;  %p292_p4 = scmp.ne.s32.totalorder (!%p83_p2), %s385_s7, 0 }
   0x6   : > { %86 = sbr.rel (%p83_p2) target bundleno = 616 (0x268), region = 24  ;;  %300 = vmatprep.subr.mxu0 (!%p83_p2), %v365_v3  ;;  %302 = vmatprep.mubr.msk.f32.mxu0 (!%p83_p2), %vm366_vm1, %v365_v3  ;;  %v182_v7 = vlaneseq (!%p83_p2) }
   0x8   : > { %v183_v8 = vshrl.u32 (!%p83_p2), %v182_v7, 7  ;;  %v185_v9 = vand.u32 (!%p83_p2), 127, %v182_v7 }
   0xa   : > { %vm186_vm3 = vcmp.eq.s32.totalorder (!%p83_p2), %v183_v8, %v185_v9 }
   0xd   : > { %s97_s8 = scalar_select %p96_p3, %s385_s7, 1 }
   0xe   : > { %vm192_vm4 = vcmask (!%p292_p4), 27648   ;;  %v367_v13 = vmov (!%p292_p4), 0.0  }
   0xf   : > { %s289_s9 = sshll.u32 %s97_s8, 2  ;;  %193 = vst.msk [vmem:[#allocation2] sm:$0xf] (!%p292_p4), %vm192_vm4, %v367_v13  ;;  %194 = vst.msk [vmem:[#allocation3] sm:$0xf] (!%p292_p4), %vm192_vm4, %v367_v13 }
  0x10   : > { %s99_s12 = scalar_lea.vmem %s425_s0, %s289_s9 }
  0x11   : > { %v100_v0 = vld [vmem:[%s99_s12] sm:$0xf] }
  0x12   : > { %v101_v1 = vmul.f32 %v100_v0, %v100_v0 }
  0x14   : > { %v103_v2 = vsel %vm102_vm0, %v101_v1, 0.0 }
  0x15   : > { %104 = vadd.xlane.f32.xlu0 %v103_v2 }
  0xa2   : > { %v105_v4 = vpop.xlane.xlu0 %104 }
  0xa3   : > { %323 = vrsqrt.f32 %v105_v4 }
  0xad   : > { %v324_v5 = vpop.eup %323 }
  0xae   : > { %v107_v6 = vmul.f32 %v324_v5, %v100_v0 }
  0xb0   : > { %301 = vmatpush3.xpose.msk.msra.mxu0 %vm108_vm2, %v107_v6 }
  0xb3   : > { %303 = vmatmul.mubr.msk.f32.vlgmr.msra.gmra.mrb[0].mxu0 %vm108_vm2, %v107_v6 }
 0x181   : > { %191 = sbr.rel (%p292_p4) target bundleno = 392 (0x188), region = 28 }
 0x186   : > { %v178_v10 = vpop.f32.mrb[0].mxu0 }
 0x187   : > { %v187_v11 = vsel %vm186_vm3, 0.0, %v178_v10  ;;  %v304_v12 = vpop.f32.mrb[1].mxu0 }
 0x188 PF: > { %v195_v14 = vld [vmem:[#allocation2] sm:$0xf]  ;;  %vm197_vm5 = vcmask 27648   ;;  %v199_v15 = vld [vmem:[#allocation3] sm:$0xf]  ;;  %v200_v16 = vmul.f32 %v187_v11, %v187_v11  ;;  %p293_p5 = scmp.ne.s32.totalorder %s385_s7, 1 }
 0x189   : > { %v196_v17 = vadd.f32 %v195_v14, %v187_v11  ;;  %vm229_vm8 = vcmask (!%p293_p5), 31744   ;;  %vm237_vm9 = vcmask (!%p293_p5), 0  }
 0x18a   : > { %v201_v18 = vadd.f32 %v200_v16, %v199_v15  ;;  %206 = sbr.rel (%p293_p5) target bundleno = 591 (0x24f), region = 32 }
 0x18b   : > { %198 = vst.msk [vmem:[#allocation2] sm:$0xf] %vm197_vm5, %v196_v17 }
 0x18c   : > { %202 = vst.msk [vmem:[#allocation3] sm:$0xf] %vm197_vm5, %v201_v18 }
 0x192   : > { %v207_v19 = vld [vmem:[#allocation2] sm:$0xf] }
 0x193   : > { %v209_v20 = vmul.f32 0.5, %v207_v19  ;;  %v210_v22 = vld [vmem:[#allocation3] sm:$0xf] }
 0x195   : > { %v211_v21 = vmul.f32 2.0, %v209_v20 }
 0x197   : > { %v212_v23 = vmul.f32 %v211_v21, %v209_v20 }
 0x199   : > { %v213_v24 = vsub.f32 %v210_v22, %v212_v23 }
 0x19b   : > { %v214_v25 = vmax.f32 %v213_v24, 0.0 }
 0x19d   : > { %325 = vrsqrt.f32 %v214_v25  ;;  %vm217_vm6 = vcmp.eq.f32.partialorder %v214_v25, inf  ;;  %v220_v27 = vand.u32 2147483648, %v214_v25  ;;  %vm219_vm7 = vcmp.eq.f32.partialorder %v214_v25, 0.0 }
 0x1a7   : > { %v326_v26 = vpop.eup %325 }
 0x1a8   : > { %v216_v28 = vmul.f32 %v326_v26, %v214_v25 }
 0x1aa   : > { %v218_v29 = vsel %vm217_vm6, %v214_v25, %v216_v28 }
 0x1ab   : > { %v221_v30 = vsel %vm219_vm7, %v220_v27, %v218_v29 }
 0x1ac   : > { %v222_v31 = vsel %vm197_vm5, %v221_v30, 0.0 }
 0x1ad   : > { %v223_v32 = vrot.slane %v222_v31, 4 }
 0x1af   : > { %v224_v33 = vadd.f32 %v223_v32, %v222_v31 }
 0x1b1   : > { %v225_v34 = vrot.slane %v224_v33, 2 }
 0x1b3   : > { %v226_v35 = vadd.f32 %v225_v34, %v224_v33 }
 0x1b5   : > { %v227_v36 = vrot.slane %v226_v35, 1 }
 0x1b7   : > { %v228_v37 = vadd.f32 %v227_v36, %v226_v35 }
 0x1b9   : > { %v230_v38 = vsel %vm229_vm8, %v228_v37, 0.0 }
 0x1ba   : > { %231 = vadd.xlane.f32.xlu0 %v230_v38 }
 0x247   : > { %v232_v39 = vpop.xlane.xlu0 %231 }
 0x248   : > { %v234_v40 = vmul.f32 0.0625, %v232_v39 }
 0x24a   : > { %v235_v41 = vmul.f32 1.5625, %v234_v40 }
 0x24c   : > { %v236_v42 = vmul.f32 100.0, %v235_v41 }
 0x24e   : > { %238 = vst.msk [vmem:[#allocation4] sm:$0x1] %vm237_vm9, %v236_v42 }
 0x24f PF: > { %p309_p6 = scmp.eq.s32.totalorder %s385_s7, 1  ;;  %s368_s13 = smov [#allocation4]  }
 0x250   : > { %s246_s14 = sshll.u32 %s368_s13, 4  ;;  %s247_s14 = int_to_ptr.vmem [resolvable:$true] %s246_s14 }
 0x251   : > { %s327_s15 = scalar_lea.vmem %s247_s14, 16  ;;  %s333_s16 = scalar_lea.vmem %s247_s14, 32 }
 0x252   : > { %p328_p7 = scmp.ne.s32.totalorder %s247_s14, %s327_s15  ;;  %p334_p10 = scmp.lt.s32.totalorder %s247_s14, %s247_s14 }
 0x253   : > { %p335_p11 = scmp.lt.s32.totalorder %s333_s16, %s327_s15 }
 0x254   : > { %p329_p8 = pnand %p328_p7, %p309_p6 }
 0x255   : > { %p336_p12 = por %p335_p11, %p334_p10 }
 0x256   : > { %p330_p9 = pneg %p329_p8 }
 0x258   : > { %p337_p13 = pnand %p336_p12, %p330_p9 }
 0x25a   : > { %340 = shalt.err (!%p337_p13)
}
 0x25b   : > { %s341_s19 = scalar_lea.hbm %s426_s1, 16 }
 0x25c   : > { %p342_p0 = scmp.ne.s32.totalorder %s426_s1, %s341_s19  ;;  %p347_p3 = scmp.lt.u32.totalorder %s341_s19, %s426_s1 }
 0x25e   : > { %p343_p1 = pnand %p342_p0, %p309_p6 }
 0x260   : > { %p344_p2 = pneg %p343_p1 }
 0x262   : > { %p349_p4 = pnand %p347_p3, %p344_p2 }
 0x264   : > { %352 = shalt.err (!%p349_p4)
}
 0x265   : > { %306 = dma.vmem_to_hbm [thread:$0]  (%p309_p6), %s247_s14, 16, %s426_s1, [#allocation5]  }
 0x266   : > { %358 = dma.done.wait (%p309_p6), [#allocation5], 16  }
 0x267   : > { %360 = vsyncadd (%p309_p6), [#allocation5], 4294967280 }
 0x268 PF: > { %s12_s6 = sadd.s32 1, %s363_s6  }
 0x269   : > { %p9_p5 = scmp.ge.s32.totalorder %s12_s6, 4  }
 0x26b   :  { %11 = sbr.rel (!%p9_p5) target bundleno = 1 (0x1), region = 59 }
 0x272   :  { %259 = vsyncpa [#allocation5], 1 }
 0x273   :  { %261 = vsyncpa [#allocation5 + $0x1], 1 }

// kernel: my_loss_ablation_2c.7
= control target key start
LH: loop header
LB: loop body
LE: loop exit
PB: predicated region body
PF: predicated region fallthrough
CT: control target
= control target key end

     0   :  { %vm30_vm0 = vcmask 261120   ;;  %v331_v0 = vmov 0.0   ;;  %vm332_vm1 = vmmov 0   ;;  %vm21_vm2 = vcmask 7168   ;;  %s398_s2 = inlined_call_operand.vmem [shape: f32[8,32], index: 2, kind: input, shape index: {}, may-alias: {1,2}]   ;;  %s399_s0 = inlined_call_operand.vmem [shape: f32[8,32], index: 0, kind: input, shape index: {}, may-alias: {0,3}]   ;;  %s400_s3 = inlined_call_operand.vmem [shape: f32[8,32], index: 3, kind: input, shape index: {}, may-alias: {0,3}]   ;;  %s401_s1 = inlined_call_operand.vmem [shape: f32[8,32], index: 1, kind: input, shape index: {}, may-alias: {1,2}]   ;;  %s402_s4 = inlined_call_operand.vmem [shape: f32[8,1], index: 4, kind: output, shape index: {}]  }
   0x1   :  { %303 = vmatprep.subr.mxu0 %v331_v0  ;;  %v29_v1 = vld [vmem:[%s398_s2] sm:$0xff]  ;;  %305 = vmatprep.mubr.msk.f32.mxu0 %vm332_vm1, %v331_v0  ;;  %v333_v5 = vmov -inf   ;;  %24 = vst.msk [vmem:[#allocation3] sm:$0xff] %vm21_vm2, %v331_v0  ;;  %25 = vst.msk [vmem:[#allocation6] sm:$0xff] %vm21_vm2, %v331_v0  ;;  %vm210_vm3 = vcmask 64512   ;;  %v334_v12 = vmov 0   ;;  %v186_v23 = vlaneseq }
   0x2   :  { %v108_v2 = vld [vmem:[%s400_s3] sm:$0xff]  ;;  %304 = vmatpush3.xpose.msk.msra.mxu0 %vm30_vm0, %v29_v1  ;;  %308 = vmatprep.subr.mxu1 %v331_v0  ;;  %22 = vst.msk [vmem:[#allocation2] sm:$0xff] %vm21_vm2, %v333_v5  ;;  %23 = vst.msk [vmem:[#allocation5] sm:$0xff] %vm21_vm2, %v333_v5 }
   0x3   :  { %v28_v3 = vld [vmem:[%s399_s0] sm:$0xff]  ;;  %309 = vmatpush3.xpose.msk.msra.mxu1 %vm30_vm0, %v108_v2  ;;  %310 = vmatprep.mubr.msk.f32.mxu1 %vm332_vm1, %v331_v0  ;;  %26 = vst.msk [vmem:[#allocation4] sm:$0xff] %vm21_vm2, %v331_v0  ;;  %27 = vst.msk [vmem:[#allocation7] sm:$0xff] %vm21_vm2, %v331_v0  ;;  %v187_v27 = vshrl.u32 %v186_v23, 7  ;;  %v192_v29 = vand.u32 127, %v186_v23 }
   0x4   :  { %v107_v4 = vld [vmem:[%s401_s1] sm:$0xff]  ;;  %317 = vset.pattern.permute.xlu1 %v334_v12  ;;  %318 = vset.pattern.permute.xlu0 %v334_v12 }
   0x5   :  { %306 = vmatmul.mubr.msk.f32.vlgmr.msra.gmra.mrb[0].mxu0 %vm30_vm0, %v28_v3  ;;  %v199_v30 = vand.u32 3, %v187_v27 }
   0x6   :  { %311 = vmatmul.mubr.msk.f32.vlgmr.msra.gmra.mrb[0].mxu1 %vm30_vm0, %v107_v4 }
   0x7   :  { %vm207_vm4 = vcmp.eq.s32.totalorder %v192_v29, %v199_v30 }
   0x8   :  { %v229_v42 = vld [vmem:[#allocation3] sm:$0xff]  ;;  %v253_v46 = vld [vmem:[#allocation6] sm:$0xff] }
   0x9   :  { %v224_v13 = vld [vmem:[#allocation2] sm:$0xff]  ;;  %v248_v16 = vld [vmem:[#allocation5] sm:$0xff] }
   0xa   :  { %v208_v48 = vld [vmem:[#allocation4] sm:$0xff]  ;;  %v217_v54 = vld [vmem:[#allocation7] sm:$0xff] }
  0xd8   :  { %v103_v6 = vpop.f32.mrb[0].mxu0 }
  0xd9   :  { %v307_v7 = vpop.f32.mrb[1].mxu0  ;;  %v225_v8 = vsel %vm210_vm3, %v103_v6, -inf  ;;  %v181_v9 = vpop.f32.mrb[0].mxu1  ;;  %v209_v33 = vsel %vm207_vm4, %v103_v6, 0.0 }
  0xda   :  { %226 = vmax.xlane.f32.xlu0 %v225_v8  ;;  %v312_v10 = vpop.f32.mrb[1].mxu1  ;;  %v249_v11 = vsel %vm210_vm3, %v181_v9, -inf  ;;  %v211_v36 = vsel %vm210_vm3, %v209_v33, 0.0  ;;  %v218_v37 = vsel %vm207_vm4, %v181_v9, 0.0 }
  0xdb   :  { %v219_v38 = vsel %vm210_vm3, %v218_v37, 0.0 }
  0xde   :  { %250 = vmax.xlane.f32.xlu0 %v249_v11 }
 0x167   :  { %v227_v14 = vpop.xlane.xlu0 %226 }
 0x168   :  { %v228_v15 = vmax.f32 %v224_v13, %v227_v14 }
 0x16a   :  { %v230_v17 = vsub.f32 %v224_v13, %v228_v15  ;;  %247 = vst.msk [vmem:[#allocation2] sm:$0xff] %vm21_vm2, %v228_v15  ;;  %236 = vperm.xlu1 %317, %v228_v15  }
 0x16b   :  { %v251_v18 = vpop.xlane.xlu0 %250 }
 0x16c   :  { %v252_v19 = vmax.f32 %v248_v16, %v251_v18  ;;  %v231_v39 = vmul.f32 1.442695, %v230_v17 }
 0x16e   :  { %v254_v20 = vsub.f32 %v248_v16, %v252_v19  ;;  %271 = vst.msk [vmem:[#allocation5] sm:$0xff] %vm21_vm2, %v252_v19  ;;  %260 = vperm.xlu1 %317, %v252_v19  }
 0x170   :  { %v255_v40 = vmul.f32 1.442695, %v254_v20 }
 0x171   :  { %v275_v62 = vld [vmem:[#allocation2] sm:$0xff] }
 0x175   :  { %v280_v1 = vld [vmem:[#allocation5] sm:$0xff] }
 0x1e9   :  { %v237_v21 = vpop.permute.xlu1 %236 }
 0x1ea   :  { %v239_v22 = vsub.f32 %v103_v6, %v237_v21 }
 0x1ec   :  { %v240_v24 = vmul.f32 1.442695, %v239_v22 }
 0x1ed   :  { %v261_v25 = vpop.permute.xlu1 %260 }
 0x1ee   :  { %319 = vpow2.f32 %v240_v24  ;;  %v263_v26 = vsub.f32 %v181_v9, %v261_v25 }
 0x1f0   :  { %v264_v28 = vmul.f32 1.442695, %v263_v26 }
 0x1f2   :  { %321 = vpow2.f32 %v264_v28 }
 0x1f3   :  { %323 = vpow2.f32 %v231_v39 }
 0x1f4   :  { %325 = vpow2.f32 %v255_v40 }
 0x1f8   :  { %v320_v31 = vpop.eup %319 }
 0x1f9   :  { %v242_v32 = vsel %vm210_vm3, %v320_v31, 0.0 }
 0x1fa   :  { %243 = vadd.xlane.f32.xlu0 %v242_v32 }
 0x1fc   :  { %v322_v34 = vpop.eup %321 }
 0x1fd   :  { %v266_v35 = vsel %vm210_vm3, %v322_v34, 0.0  ;;  %v324_v41 = vpop.eup %323 }
 0x1fe   :  { %267 = vadd.xlane.f32.xlu1 %v266_v35  ;;  %212 = vadd.xlane.f32.xlu0 %v211_v36  ;;  %v233_v43 = vmul.f32 %v324_v41, %v229_v42  ;;  %v326_v44 = vpop.eup %325 }
 0x1ff   :  { %v257_v49 = vmul.f32 %v326_v44, %v253_v46 }
 0x202   :  { %220 = vadd.xlane.f32.xlu0 %v219_v38 }
 0x287   :  { %v244_v45 = vpop.xlane.xlu0 %243 }
 0x288   :  { %v245_v47 = vadd.f32 %v244_v45, %v233_v43 }
 0x28a   :  { %246 = vst.msk [vmem:[#allocation3] sm:$0xff] %vm21_vm2, %v245_v47 }
 0x28b   :  { %v268_v50 = vpop.xlane.xlu1 %267  ;;  %v213_v51 = vpop.xlane.xlu0 %212 }
 0x28c   :  { %v269_v52 = vadd.f32 %v268_v50, %v257_v49  ;;  %v214_v53 = vadd.f32 %v213_v51, %v208_v48 }
 0x28e   :  { %270 = vst.msk [vmem:[#allocation6] sm:$0xff] %vm21_vm2, %v269_v52  ;;  %216 = vst.msk [vmem:[#allocation4] sm:$0xff] %vm21_vm2, %v214_v53 }
 0x28f   :  { %v221_v55 = vpop.xlane.xlu0 %220 }
 0x290   :  { %v222_v56 = vadd.f32 %v221_v55, %v217_v54 }
 0x291   :  { %v276_v57 = vld [vmem:[#allocation3] sm:$0xff] }
 0x292   :  { %327 = vlog2.f32 %v276_v57  ;;  %223 = vst.msk [vmem:[#allocation7] sm:$0xff] %vm21_vm2, %v222_v56 }
 0x295   :  { %v281_v58 = vld [vmem:[#allocation6] sm:$0xff]  ;;  %v285_v3 = vld [vmem:[#allocation4] sm:$0xff] }
 0x296   :  { %329 = vlog2.f32 %v281_v58 }
 0x299   :  { %v287_v4 = vld [vmem:[#allocation7] sm:$0xff] }
 0x29c   :  { %v328_v59 = vpop.eup %327 }
 0x29d   :  { %v278_v60 = vmul.f32 0.6931472, %v328_v59 }
 0x29f   :  { %v279_v63 = vadd.f32 %v278_v60, %v275_v62 }
 0x2a0   :  { %v330_v61 = vpop.eup %329 }
 0x2a1   :  { %v283_v0 = vmul.f32 0.6931472, %v330_v61  ;;  %v286_v5 = vsub.f32 %v279_v63, %v285_v3 }
 0x2a3   :  { %v284_v2 = vadd.f32 %v283_v0, %v280_v1 }
 0x2a5   :  { %v288_v6 = vsub.f32 %v284_v2, %v287_v4 }
 0x2a7   :  { %v289_v7 = vadd.f32 %v288_v6, %v286_v5 }
 0x2a9   :  { %290 = vst.msk [vmem:[%s402_s4] sm:$0xff] %vm21_vm2, %v289_v7 }

// kernel: my_loss_ablation_2c.6
= control target key start
LH: loop header
LB: loop body
LE: loop exit
PB: predicated region body
PF: predicated region fallthrough
CT: control target
= control target key end

     0   :  { %9 = vsyncpa [#allocation9], 0  ;;  %s490_s0 = inlined_call_operand.vmem [shape: f32[8,32], index: 0, kind: input, shape index: {}, may-alias: {0,3}]   ;;  %s491_s1 = inlined_call_operand.hbm [shape: f32[8,32], index: 1, kind: input, shape index: {}, may-alias: {1,2}]   ;;  %s492_s2 = inlined_call_operand.hbm [shape: f32[8,32], index: 2, kind: input, shape index: {}, may-alias: {1,2}]   ;;  %s493_s3 = inlined_call_operand.vmem [shape: f32[8,32], index: 3, kind: input, shape index: {}, may-alias: {0,3}]   ;;  %s494_s4 = inlined_call_operand.vmem [shape: f32[8,1], index: 4, kind: output, shape index: {}]  }
   0x1   :  { %10 = vsyncpa [#allocation11], 0  ;;  %s407_s15 = smov [#allocation8]   ;;  %s408_s17 = smov [#allocation10]  }
   0x2   :  { %s19_s16 = sshll.u32 %s407_s15, 4  ;;  %s29_s18 = sshll.u32 %s408_s17, 4  ;;  %s20_s16 = int_to_ptr.vmem [resolvable:$true] %s19_s16  ;;  %s30_s18 = int_to_ptr.vmem [resolvable:$true] %s29_s18 }
   0x3   :  { %s359_s21 = scalar_lea.hbm %s491_s1, 128 }
   0x4   :  { %p360_p0 = scmp.ne.s32.totalorder %s491_s1, %s359_s21  ;;  %p363_p1 = scmp.lt.u32.totalorder %s359_s21, %s491_s1 }
   0x6   :  { %p365_p2 = pnand %p363_p1, %p360_p0 }
   0x8   :  { %368 = shalt.err (!%p365_p2)
}
   0x9   :  { %s369_s26 = scalar_lea.vmem %s20_s16, 128  ;;  %p374_p4 = scmp.lt.s32.totalorder %s20_s16, %s20_s16 }
   0xa   :  { %p370_p3 = scmp.ne.s32.totalorder %s20_s16, %s369_s26  ;;  %p375_p5 = scmp.lt.s32.totalorder %s369_s26, %s369_s26 }
   0xc   :  { %p376_p6 = por %p375_p5, %p374_p4 }
   0xe   :  { %p377_p7 = pnand %p376_p6, %p370_p3 }
  0x10   :  { %380 = shalt.err (!%p377_p7)
}
  0x11   :  { %22 = dma.hbm_to_vmem [thread:$0]  %s491_s1, 128, %s20_s16, [#allocation9]  }
  0x12   :  { %s381_s5 = scalar_lea.hbm %s492_s2, 128 }
  0x13   :  { %p382_p8 = scmp.ne.s32.totalorder %s492_s2, %s381_s5  ;;  %p385_p9 = scmp.lt.u32.totalorder %s381_s5, %s492_s2 }
  0x15   :  { %p387_p10 = pnand %p385_p9, %p382_p8 }
  0x17   :  { %390 = shalt.err (!%p387_p10)
}
  0x18   :  { %s391_s10 = scalar_lea.vmem %s30_s18, 128  ;;  %p396_p12 = scmp.lt.s32.totalorder %s30_s18, %s30_s18 }
  0x19   :  { %p392_p11 = scmp.ne.s32.totalorder %s30_s18, %s391_s10  ;;  %p397_p13 = scmp.lt.s32.totalorder %s391_s10, %s391_s10 }
  0x1b   :  { %p398_p0 = por %p397_p13, %p396_p12 }
  0x1d   :  { %p399_p1 = pnand %p398_p0, %p392_p11 }
  0x1f   :  { %402 = shalt.err (!%p399_p1)
}
  0x20   :  { %32 = dma.hbm_to_vmem [thread:$0]  %s492_s2, 128, %s30_s18, [#allocation11]  }
  0x21   :  { %403 = dma.done.wait [#allocation9], 128  }
  0x22   :  { %404 = vsyncadd [#allocation9], 4294967168 }
  0x23   :  { %405 = dma.done.wait [#allocation11], 128  }
  0x24   :  { %406 = vsyncadd [#allocation11], 4294967168  ;;  %v409_v0 = vmov 0.0   ;;  %vm410_vm0 = vmmov 0   ;;  %vm54_vm1 = vcmask 261120   ;;  %v53_v1 = vld [vmem:[#allocation10] sm:$0xff]  ;;  %v210_v23 = vlaneseq }
  0x25   :  { %329 = vmatprep.subr.mxu0 %v409_v0  ;;  %331 = vmatprep.mubr.msk.f32.mxu0 %vm410_vm0, %v409_v0  ;;  %v132_v2 = vld [vmem:[%s493_s3] sm:$0xff]  ;;  %v131_v4 = vld [vmem:[#allocation8] sm:$0xff]  ;;  %vm45_vm2 = vcmask 7168   ;;  %v411_v5 = vmov -inf   ;;  %vm234_vm3 = vcmask 64512   ;;  %v412_v12 = vmov 0  }
  0x26   :  { %334 = vmatprep.subr.mxu1 %v409_v0  ;;  %336 = vmatprep.mubr.msk.f32.mxu1 %vm410_vm0, %v409_v0  ;;  %v52_v3 = vld [vmem:[%s490_s0] sm:$0xff]  ;;  %46 = vst.msk [vmem:[#allocation2] sm:$0xff] %vm45_vm2, %v411_v5  ;;  %47 = vst.msk [vmem:[#allocation5] sm:$0xff] %vm45_vm2, %v411_v5  ;;  %v211_v27 = vshrl.u32 %v210_v23, 7  ;;  %v216_v29 = vand.u32 127, %v210_v23 }
  0x27   :  { %330 = vmatpush3.xpose.msk.msra.mxu0 %vm54_vm1, %v53_v1  ;;  %335 = vmatpush3.xpose.msk.msra.mxu1 %vm54_vm1, %v132_v2  ;;  %48 = vst.msk [vmem:[#allocation3] sm:$0xff] %vm45_vm2, %v409_v0  ;;  %49 = vst.msk [vmem:[#allocation6] sm:$0xff] %vm45_vm2, %v409_v0 }
  0x28   :  { %50 = vst.msk [vmem:[#allocation4] sm:$0xff] %vm45_vm2, %v409_v0  ;;  %51 = vst.msk [vmem:[#allocation7] sm:$0xff] %vm45_vm2, %v409_v0  ;;  %345 = vset.pattern.permute.xlu1 %v412_v12  ;;  %346 = vset.pattern.permute.xlu0 %v412_v12  ;;  %v223_v30 = vand.u32 3, %v211_v27 }
  0x2a   :  { %332 = vmatmul.mubr.msk.f32.vlgmr.msra.gmra.mrb[0].mxu0 %vm54_vm1, %v52_v3  ;;  %337 = vmatmul.mubr.msk.f32.vlgmr.msra.gmra.mrb[0].mxu1 %vm54_vm1, %v131_v4  ;;  %vm231_vm4 = vcmp.eq.s32.totalorder %v216_v29, %v223_v30 }
  0x2d   :  { %v248_v13 = vld [vmem:[#allocation2] sm:$0xff]  ;;  %v272_v16 = vld [vmem:[#allocation5] sm:$0xff] }
  0x2e   :  { %v253_v42 = vld [vmem:[#allocation3] sm:$0xff]  ;;  %v277_v46 = vld [vmem:[#allocation6] sm:$0xff] }
  0x2f   :  { %v232_v48 = vld [vmem:[#allocation4] sm:$0xff]  ;;  %v241_v54 = vld [vmem:[#allocation7] sm:$0xff] }
  0xfd   :  { %v127_v6 = vpop.f32.mrb[0].mxu0  ;;  %v205_v7 = vpop.f32.mrb[0].mxu1 }
  0xfe   :  { %v333_v8 = vpop.f32.mrb[1].mxu0  ;;  %v249_v9 = vsel %vm234_vm3, %v127_v6, -inf  ;;  %v338_v10 = vpop.f32.mrb[1].mxu1  ;;  %v273_v11 = vsel %vm234_vm3, %v205_v7, -inf  ;;  %v233_v33 = vsel %vm231_vm4, %v127_v6, 0.0  ;;  %v242_v37 = vsel %vm231_vm4, %v205_v7, 0.0 }
  0xff   :  { %250 = vmax.xlane.f32.xlu0 %v249_v9  ;;  %v235_v35 = vsel %vm234_vm3, %v233_v33, 0.0  ;;  %v243_v38 = vsel %vm234_vm3, %v242_v37, 0.0 }
 0x103   :  { %274 = vmax.xlane.f32.xlu0 %v273_v11 }
 0x18c   :  { %v251_v14 = vpop.xlane.xlu0 %250 }
 0x18d   :  { %v252_v15 = vmax.f32 %v248_v13, %v251_v14 }
 0x18f   :  { %v254_v17 = vsub.f32 %v248_v13, %v252_v15  ;;  %271 = vst.msk [vmem:[#allocation2] sm:$0xff] %vm45_vm2, %v252_v15  ;;  %260 = vperm.xlu1 %345, %v252_v15  }
 0x190   :  { %v275_v18 = vpop.xlane.xlu0 %274 }
 0x191   :  { %v276_v19 = vmax.f32 %v272_v16, %v275_v18  ;;  %v255_v39 = vmul.f32 1.442695, %v254_v17 }
 0x193   :  { %v278_v20 = vsub.f32 %v272_v16, %v276_v19  ;;  %295 = vst.msk [vmem:[#allocation5] sm:$0xff] %vm45_vm2, %v276_v19  ;;  %284 = vperm.xlu1 %345, %v276_v19  }
 0x195   :  { %v279_v40 = vmul.f32 1.442695, %v278_v20 }
 0x196   :  { %v299_v62 = vld [vmem:[#allocation2] sm:$0xff] }
 0x19a   :  { %v304_v1 = vld [vmem:[#allocation5] sm:$0xff] }
 0x20e   :  { %v261_v21 = vpop.permute.xlu1 %260 }
 0x20f   :  { %v263_v22 = vsub.f32 %v127_v6, %v261_v21 }
 0x211   :  { %v264_v24 = vmul.f32 1.442695, %v263_v22 }
 0x212   :  { %v285_v25 = vpop.permute.xlu1 %284 }
 0x213   :  { %347 = vpow2.f32 %v264_v24  ;;  %v287_v26 = vsub.f32 %v205_v7, %v285_v25 }
 0x215   :  { %v288_v28 = vmul.f32 1.442695, %v287_v26 }
 0x217   :  { %349 = vpow2.f32 %v288_v28 }
 0x218   :  { %351 = vpow2.f32 %v255_v39 }
 0x219   :  { %353 = vpow2.f32 %v279_v40 }
 0x21d   :  { %v348_v31 = vpop.eup %347 }
 0x21e   :  { %v266_v32 = vsel %vm234_vm3, %v348_v31, 0.0 }
 0x21f   :  { %267 = vadd.xlane.f32.xlu0 %v266_v32 }
 0x221   :  { %v350_v34 = vpop.eup %349 }
 0x222   :  { %v290_v36 = vsel %vm234_vm3, %v350_v34, 0.0  ;;  %v352_v41 = vpop.eup %351 }
 0x223   :  { %236 = vadd.xlane.f32.xlu0 %v235_v35  ;;  %291 = vadd.xlane.f32.xlu1 %v290_v36  ;;  %v257_v43 = vmul.f32 %v352_v41, %v253_v42  ;;  %v354_v44 = vpop.eup %353 }
 0x224   :  { %v281_v49 = vmul.f32 %v354_v44, %v277_v46 }
 0x227   :  { %244 = vadd.xlane.f32.xlu0 %v243_v38 }
 0x2ac   :  { %v268_v45 = vpop.xlane.xlu0 %267 }
 0x2ad   :  { %v269_v47 = vadd.f32 %v268_v45, %v257_v43 }
 0x2af   :  { %270 = vst.msk [vmem:[#allocation3] sm:$0xff] %vm45_vm2, %v269_v47 }
 0x2b0   :  { %v237_v50 = vpop.xlane.xlu0 %236  ;;  %v292_v51 = vpop.xlane.xlu1 %291 }
 0x2b1   :  { %v238_v52 = vadd.f32 %v237_v50, %v232_v48  ;;  %v293_v53 = vadd.f32 %v292_v51, %v281_v49 }
 0x2b3   :  { %240 = vst.msk [vmem:[#allocation4] sm:$0xff] %vm45_vm2, %v238_v52  ;;  %294 = vst.msk [vmem:[#allocation6] sm:$0xff] %vm45_vm2, %v293_v53 }
 0x2b4   :  { %v245_v55 = vpop.xlane.xlu0 %244 }
 0x2b5   :  { %v246_v56 = vadd.f32 %v245_v55, %v241_v54 }
 0x2b6   :  { %v300_v57 = vld [vmem:[#allocation3] sm:$0xff] }
 0x2b7   :  { %355 = vlog2.f32 %v300_v57  ;;  %247 = vst.msk [vmem:[#allocation7] sm:$0xff] %vm45_vm2, %v246_v56 }
 0x2ba   :  { %v305_v58 = vld [vmem:[#allocation6] sm:$0xff]  ;;  %v309_v3 = vld [vmem:[#allocation4] sm:$0xff] }
 0x2bb   :  { %357 = vlog2.f32 %v305_v58 }
 0x2be   :  { %v311_v4 = vld [vmem:[#allocation7] sm:$0xff] }
 0x2c1   :  { %v356_v59 = vpop.eup %355 }
 0x2c2   :  { %v302_v60 = vmul.f32 0.6931472, %v356_v59 }
 0x2c4   :  { %v303_v63 = vadd.f32 %v302_v60, %v299_v62 }
 0x2c5   :  { %v358_v61 = vpop.eup %357 }
 0x2c6   :  { %v307_v0 = vmul.f32 0.6931472, %v358_v61  ;;  %v310_v5 = vsub.f32 %v303_v63, %v309_v3 }
 0x2c8   :  { %v308_v2 = vadd.f32 %v307_v0, %v304_v1 }
 0x2ca   :  { %v312_v6 = vsub.f32 %v308_v2, %v311_v4 }
 0x2cc   :  { %v313_v7 = vadd.f32 %v312_v6, %v310_v5 }
 0x2ce   :  { %314 = vst.msk [vmem:[%s494_s4] sm:$0xff] %vm45_vm2, %v313_v7 }
 0x2cf   :  { %319 = vsyncpa [#allocation9], 1 }
 0x2d0   :  { %320 = vsyncpa [#allocation11], 1 }

</bundles_post_ra>
